<compile_context>
chip_gen: v5e
topology: v5e:2x2
jax: 0.10.0
libtpu: 0.0.40
codegen_flags: <defaults>
</compile_context>

<pallas_src>
import jax
import jax.numpy as jnp
from jax import lax
from jax.experimental import pallas as pl
from jax.experimental.pallas import tpu as pltpu

NOISY_SIGMA_INIT = 2.5


def _round_up(x, m):
    return (x + m - 1) // m * m


def _pick_tile(padded_dim, max_tile):
    """Largest multiple of 128 <= max_tile that divides padded_dim."""
    t = min(max_tile, padded_dim)
    while padded_dim % t:
        t -= 128
    return t


# ----------------------------------------------------------------------------
# Kernel: grid = (out_f tiles j [parallel], in_f tiles k [arbitrary reduction]).
#   x_ref    : (B_p, tk)   compute dtype
#   wmu_ref  : (tn, tk)    compute dtype   (out_f, in_f layout, never transposed)
#   wsig_ref : (tn, tk)    compute dtype
#   ein_ref  : (1, tk)     compute dtype   (factorized noise, input side)
#   eout_ref : (1, tn)     f32             (factorized noise, output side)
#   bmu_ref  : (1, tn)     f32
#   bsig_ref : (1, tn)     f32
#   o_ref    : (B_p, tn)   output dtype
#   acc_ref  : (B_p, tn)   f32 VMEM scratch accumulator
# ----------------------------------------------------------------------------
def noisy_linear_kernel(x_ref, wmu_ref, wsig_ref, ein_ref, eout_ref,
                        bmu_ref, bsig_ref, o_ref, acc_ref):
    k = pl.program_id(1)

    @pl.when(k == 0)
    def _init():
        acc_ref[...] = jnp.zeros_like(acc_ref)

    x = x_ref[...]                                  # (B_p, tk)
    xn = x * ein_ref[...]                           # fold eps_in into activations (rank-1 noise)
    # Contract dim 1 of x with dim 1 of w -> (B_p, tn); MXU-native, no explicit transpose.
    dn = (((1,), (1,)), ((), ()))
    mu_part = lax.dot_general(x, wmu_ref[...], dn, preferred_element_type=jnp.float32)
    sig_part = lax.dot_general(xn, wsig_ref[...], dn, preferred_element_type=jnp.float32)
    acc_ref[...] += mu_part + sig_part * eout_ref[...]

    @pl.when(k == pl.num_programs(1) - 1)
    def _finalize():
        # Bias built once per output tile (hoisted out of the K loop).
        b = bmu_ref[...] + bsig_ref[...] * eout_ref[...]        # (1, tn) f32
        o_ref[...] = (acc_ref[...] + b).astype(o_ref.dtype)


def noisy_linear(x, weight_mu, weight_sigma, eps_in, eps_out, bias_mu, bias_sigma,
                 *, training=True, use_bf16=True, tn_max=256, tk_max=512,
                 vmem_limit_bytes=32 * 1024 * 1024):
    """NoisyLinear forward. x: (B, in_f) -> (B, out_f).

    eps_in (in_f,), eps_out (out_f,) are the factorized-noise vectors
    (weight_epsilon == outer(eps_out, eps_in), bias_epsilon == eps_out).
    """
    B, in_f = x.shape
    out_f = weight_mu.shape[0]

    if not training:
        # Eval path: w = mu, b = bias_mu  <=>  zeroed noise vectors.
        eps_in = jnp.zeros_like(eps_in)
        eps_out = jnp.zeros_like(eps_out)

    compute_dtype = jnp.bfloat16 if use_bf16 else jnp.float32

    # Lane-dense padding: batch -> multiple of 8 (sublanes), features -> multiple of 128 (lanes).
    B_p = _round_up(B, 8)
    in_p = _round_up(in_f, 128)
    out_p = _round_up(out_f, 128)

    tn = _pick_tile(out_p, tn_max)   # output-tile width  (multiple of 128)
    tk = _pick_tile(in_p, tk_max)    # reduction tile     (multiple of 128)

    # Zero padding does not perturb the dot products or the bias add.
    cd = compute_dtype
    xp = jnp.zeros((B_p, in_p), cd).at[:B, :in_f].set(x.astype(cd))
    wmu_p = jnp.zeros((out_p, in_p), cd).at[:out_f, :in_f].set(weight_mu.astype(cd))
    wsig_p = jnp.zeros((out_p, in_p), cd).at[:out_f, :in_f].set(weight_sigma.astype(cd))
    ein_p = jnp.zeros((1, in_p), cd).at[0, :in_f].set(eps_in.astype(cd))
    eout_p = jnp.zeros((1, out_p), jnp.float32).at[0, :out_f].set(eps_out.astype(jnp.float32))
    bmu_p = jnp.zeros((1, out_p), jnp.float32).at[0, :out_f].set(bias_mu.astype(jnp.float32))
    bsig_p = jnp.zeros((1, out_p), jnp.float32).at[0, :out_f].set(bias_sigma.astype(jnp.float32))

    grid = (out_p // tn, in_p // tk)

    out = pl.pallas_call(
        noisy_linear_kernel,
        out_shape=jax.ShapeDtypeStruct((B_p, out_p), x.dtype),
        grid_spec=pltpu.PrefetchScalarGridSpec(
            num_scalar_prefetch=0,
            grid=grid,
            in_specs=[
                pl.BlockSpec((B_p, tk), lambda j, k: (0, k)),   # x
                pl.BlockSpec((tn, tk), lambda j, k: (j, k)),    # weight_mu
                pl.BlockSpec((tn, tk), lambda j, k: (j, k)),    # weight_sigma
                pl.BlockSpec((1, tk), lambda j, k: (0, k)),     # eps_in
                pl.BlockSpec((1, tn), lambda j, k: (0, j)),     # eps_out
                pl.BlockSpec((1, tn), lambda j, k: (0, j)),     # bias_mu
                pl.BlockSpec((1, tn), lambda j, k: (0, j)),     # bias_sigma
            ],
            out_specs=pl.BlockSpec((B_p, tn), lambda j, k: (0, j)),
            scratch_shapes=[pltpu.VMEM((B_p, tn), jnp.float32)],
        ),
        compiler_params=pltpu.CompilerParams(
            dimension_semantics=("parallel", "arbitrary"),
            vmem_limit_bytes=vmem_limit_bytes,
        ),
    )(xp, wmu_p, wsig_p, ein_p, eout_p, bmu_p, bsig_p)

    return out[:B, :out_f]


# ----------------------------------------------------------------------------
# Parameter / noise init mirroring __init__, reset_parameters, reset_noise.
# Returns the factorized noise vectors instead of the dense eps matrix.
# ----------------------------------------------------------------------------
def init_noisy_linear(key, in_f, out_f, sigma_init=NOISY_SIGMA_INIT):
    k_wmu, k_bmu, k_ein, k_eout = jax.random.split(key, 4)
    bound = 1.0 / (in_f ** 0.5)

    weight_mu = jax.random.uniform(k_wmu, (out_f, in_f), jnp.float32,
                                   minval=-bound, maxval=bound)
    weight_sigma = jnp.full((out_f, in_f), sigma_init / (in_f ** 0.5), jnp.float32)
    bias_mu = jax.random.uniform(k_bmu, (out_f,), jnp.float32,
                                 minval=-bound, maxval=bound)
    bias_sigma = jnp.full((out_f,), sigma_init / (out_f ** 0.5), jnp.float32)

    # Factorized Gaussian noise: f(v) = sign(v) * sqrt(|v|)
    f = lambda v: jnp.sign(v) * jnp.sqrt(jnp.abs(v))
    eps_in = f(jax.random.normal(k_ein, (in_f,), jnp.float32))
    eps_out = f(jax.random.normal(k_eout, (out_f,), jnp.float32))
    return weight_mu, weight_sigma, eps_in, eps_out, bias_mu, bias_sigma


if __name__ == "__main__":
    key = jax.random.PRNGKey(0)
    k_params, k_x = jax.random.split(key)

    # Deliberately non-aligned small shapes: exercises the padding path.
    B, in_f, out_f = 6, 300, 200
    wmu, wsig, eps_in, eps_out, bmu, bsig = init_noisy_linear(k_params, in_f, out_f)
    x = jax.random.normal(k_x, (B, in_f), jnp.float32)

    # Pure-JAX reference: exactly the PyTorch training-mode math with the dense eps matrix.
    w_ref = wmu + wsig * jnp.outer(eps_out, eps_in)
    b_ref = bmu + bsig * eps_out
    y_ref = x @ w_ref.T + b_ref

    # 1) f32 path: rank-1 reformulation is mathematically exact -> tight tolerance.
    y32 = jax.block_until_ready(
        noisy_linear(x, wmu, wsig, eps_in, eps_out, bmu, bsig, use_bf16=False))
    assert y32.shape == (B, out_f)
    assert jnp.allclose(y32, y_ref, atol=1e-4, rtol=1e-4), "f32 path mismatch"

    # 2) bf16 path (default, MXU-native on v6e/v7x): looser tolerance.
    y16 = jax.block_until_ready(
        noisy_linear(x, wmu, wsig, eps_in, eps_out, bmu, bsig, use_bf16=True))
    rel = jnp.max(jnp.abs(y16 - y_ref)) / (jnp.max(jnp.abs(y_ref)) + 1e-6)
    assert rel < 2e-2, f"bf16 path mismatch: rel={rel}"

    # 3) Forced multi-tile grid (small tiles -> multi-step K reduction + multiple out tiles).
    y_multi = jax.block_until_ready(
        noisy_linear(x, wmu, wsig, eps_in, eps_out, bmu, bsig,
                     use_bf16=False, tn_max=128, tk_max=128))
    assert jnp.allclose(y_multi, y_ref, atol=1e-4, rtol=1e-4), "multi-tile grid mismatch"

    # 4) Eval mode: w = mu, b = bias_mu.
    y_eval = jax.block_until_ready(
        noisy_linear(x, wmu, wsig, eps_in, eps_out, bmu, bsig,
                     training=False, use_bf16=False))
    assert jnp.allclose(y_eval, x @ wmu.T + bmu, atol=1e-4, rtol=1e-4), "eval path mismatch"

    print("KERNEL_OK")
</pallas_src>

<mosaic_0001>
module attributes {stable_mosaic.version = 11 : i64} {
  func.func @noisy_linear_kernel(%arg0: i32, %arg1: i32, %arg2: memref<8x384xf32, #tpu.memory_space<vmem>>, %arg3: memref<256x384xf32, #tpu.memory_space<vmem>>, %arg4: memref<256x384xf32, #tpu.memory_space<vmem>>, %arg5: memref<1x384xf32, #tpu.memory_space<vmem>>, %arg6: memref<1x256xf32, #tpu.memory_space<vmem>>, %arg7: memref<1x256xf32, #tpu.memory_space<vmem>>, %arg8: memref<1x256xf32, #tpu.memory_space<vmem>>, %arg9: memref<8x256xf32, #tpu.memory_space<vmem>>, %arg10: memref<8x256xf32, #tpu.memory_space<vmem>>) attributes {dimension_semantics = [#tpu.dimension_semantics<parallel>, #tpu.dimension_semantics<arbitrary>], iteration_bounds = array<i64: 1, 1>, scalar_prefetch = 0 : i64, scratch_operands = 1 : i64, tpu.core_type = #tpu.core_type<tc>, window_params = [{transform_indices = @transform_0, window_bounds = array<i64: 8, 384>}, {transform_indices = @transform_1, window_bounds = array<i64: 256, 384>}, {transform_indices = @transform_2, window_bounds = array<i64: 256, 384>}, {transform_indices = @transform_3, window_bounds = array<i64: 1, 384>}, {transform_indices = @transform_4, window_bounds = array<i64: 1, 256>}, {transform_indices = @transform_5, window_bounds = array<i64: 1, 256>}, {transform_indices = @transform_6, window_bounds = array<i64: 1, 256>}, {transform_indices = @transform_7, window_bounds = array<i64: 8, 256>}]} {
    %c0_i32 = arith.constant 0 : i32
    %0 = arith.cmpi eq, %arg1, %c0_i32 : i32
    %1 = arith.extui %0 : i1 to i32
    %c0_i32_0 = arith.constant 0 : i32
    %2 = arith.cmpi ne, %1, %c0_i32_0 : i32
    scf.if %2 {
      %cst_17 = arith.constant 0.000000e+00 : f32
      %21 = vector.broadcast %cst_17 : f32 to vector<8x256xf32>
      %c0_18 = arith.constant 0 : index
      %c0_19 = arith.constant 0 : index
      %22 = vector.load %arg10[%c0_18, %c0_19] : memref<8x256xf32, #tpu.memory_space<vmem>>, vector<8x256xf32>
      tpu.vector_store %arg10[%c0_18, %c0_19], %21 {strides = array<i32>} : memref<8x256xf32, #tpu.memory_space<vmem>>, vector<8x256xf32>,
    } else {
    }
    %c0 = arith.constant 0 : index
    %c0_1 = arith.constant 0 : index
    %3 = vector.load %arg2[%c0, %c0_1] : memref<8x384xf32, #tpu.memory_space<vmem>>, vector<8x384xf32>
    %c0_2 = arith.constant 0 : index
    %c0_3 = arith.constant 0 : index
    %4 = vector.load %arg5[%c0_2, %c0_3] : memref<1x384xf32, #tpu.memory_space<vmem>>, vector<1x384xf32>
    %5 = vector.broadcast %4 : vector<1x384xf32> to vector<8x384xf32>
    %6 = arith.mulf %3, %5 : vector<8x384xf32>
    %c0_4 = arith.constant 0 : index
    %c0_5 = arith.constant 0 : index
    %7 = vector.load %arg3[%c0_4, %c0_5] : memref<256x384xf32, #tpu.memory_space<vmem>>, vector<256x384xf32>
    %cst = arith.constant dense<0.000000e+00> : vector<8x256xf32>
    %8 = tpu.matmul %3, %7, %cst {dimension_numbers = #tpu.dot_dimension_numbers<[1], [1], [0], [0], [0, 0, 1, 0], [], []>} : vector<8x384xf32>, vector<256x384xf32>, vector<8x256xf32> -> vector<8x256xf32>
    %c0_6 = arith.constant 0 : index
    %c0_7 = arith.constant 0 : index
    %9 = vector.load %arg4[%c0_6, %c0_7] : memref<256x384xf32, #tpu.memory_space<vmem>>, vector<256x384xf32>
    %cst_8 = arith.constant dense<0.000000e+00> : vector<8x256xf32>
    %10 = tpu.matmul %6, %9, %cst_8 {dimension_numbers = #tpu.dot_dimension_numbers<[1], [1], [0], [0], [0, 0, 1, 0], [], []>} : vector<8x384xf32>, vector<256x384xf32>, vector<8x256xf32> -> vector<8x256xf32>
    %c0_9 = arith.constant 0 : index
    %c0_10 = arith.constant 0 : index
    %11 = vector.load %arg10[%c0_9, %c0_10] : memref<8x256xf32, #tpu.memory_space<vmem>>, vector<8x256xf32>
    %c0_11 = arith.constant 0 : index
    %c0_12 = arith.constant 0 : index
    %12 = vector.load %arg6[%c0_11, %c0_12] : memref<1x256xf32, #tpu.memory_space<vmem>>, vector<1x256xf32>
    %13 = vector.broadcast %12 : vector<1x256xf32> to vector<8x256xf32>
    %14 = arith.mulf %10, %13 : vector<8x256xf32>
    %15 = arith.addf %8, %14 : vector<8x256xf32>
    %16 = arith.addf %11, %15 : vector<8x256xf32>
    %c0_13 = arith.constant 0 : index
    %c0_14 = arith.constant 0 : index
    %17 = vector.load %arg10[%c0_13, %c0_14] : memref<8x256xf32, #tpu.memory_space<vmem>>, vector<8x256xf32>
    tpu.vector_store %arg10[%c0_13, %c0_14], %16 {strides = array<i32>} : memref<8x256xf32, #tpu.memory_space<vmem>>, vector<8x256xf32>,
    %c0_i32_15 = arith.constant 0 : i32
    %18 = arith.cmpi eq, %arg1, %c0_i32_15 : i32
    %19 = arith.extui %18 : i1 to i32
    %c0_i32_16 = arith.constant 0 : i32
    %20 = arith.cmpi ne, %19, %c0_i32_16 : i32
    scf.if %20 {
      %c0_17 = arith.constant 0 : index
      %c0_18 = arith.constant 0 : index
      %21 = vector.load %arg7[%c0_17, %c0_18] : memref<1x256xf32, #tpu.memory_space<vmem>>, vector<1x256xf32>
      %c0_19 = arith.constant 0 : index
      %c0_20 = arith.constant 0 : index
      %22 = vector.load %arg8[%c0_19, %c0_20] : memref<1x256xf32, #tpu.memory_space<vmem>>, vector<1x256xf32>
      %c0_21 = arith.constant 0 : index
      %c0_22 = arith.constant 0 : index
      %23 = vector.load %arg6[%c0_21, %c0_22] : memref<1x256xf32, #tpu.memory_space<vmem>>, vector<1x256xf32>
      %24 = arith.mulf %22, %23 : vector<1x256xf32>
      %25 = arith.addf %21, %24 : vector<1x256xf32>
      %c0_23 = arith.constant 0 : index
      %c0_24 = arith.constant 0 : index
      %26 = vector.load %arg10[%c0_23, %c0_24] : memref<8x256xf32, #tpu.memory_space<vmem>>, vector<8x256xf32>
      %27 = vector.broadcast %25 : vector<1x256xf32> to vector<8x256xf32>
      %28 = arith.addf %26, %27 : vector<8x256xf32>
      %c0_25 = arith.constant 0 : index
      %c0_26 = arith.constant 0 : index
      %29 = vector.load %arg9[%c0_25, %c0_26] : memref<8x256xf32, #tpu.memory_space<vmem>>, vector<8x256xf32>
      tpu.vector_store %arg9[%c0_25, %c0_26], %28 {strides = array<i32>} : memref<8x256xf32, #tpu.memory_space<vmem>>, vector<8x256xf32>,
    } else {
    }
    return
  }
  func.func @transform_0(%arg0: i32, %arg1: i32) -> (i32, i32) {
    %c0_i32 = arith.constant 0 : i32
    %c0_i32_0 = arith.constant 0 : i32
    return %c0_i32, %arg1 : i32, i32
  }
  func.func @transform_1(%arg0: i32, %arg1: i32) -> (i32, i32) {
    %c0_i32 = arith.constant 0 : i32
    return %arg0, %arg1 : i32, i32
  }
  func.func @transform_2(%arg0: i32, %arg1: i32) -> (i32, i32) {
    %c0_i32 = arith.constant 0 : i32
    return %arg0, %arg1 : i32, i32
  }
  func.func @transform_3(%arg0: i32, %arg1: i32) -> (i32, i32) {
    %c0_i32 = arith.constant 0 : i32
    %c0_i32_0 = arith.constant 0 : i32
    return %c0_i32, %arg1 : i32, i32
  }
  func.func @transform_4(%arg0: i32, %arg1: i32) -> (i32, i32) {
    %c0_i32 = arith.constant 0 : i32
    %c0_i32_0 = arith.constant 0 : i32
    return %c0_i32, %arg0 : i32, i32
  }
  func.func @transform_5(%arg0: i32, %arg1: i32) -> (i32, i32) {
    %c0_i32 = arith.constant 0 : i32
    %c0_i32_0 = arith.constant 0 : i32
    return %c0_i32, %arg0 : i32, i32
  }
  func.func @transform_6(%arg0: i32, %arg1: i32) -> (i32, i32) {
    %c0_i32 = arith.constant 0 : i32
    %c0_i32_0 = arith.constant 0 : i32
    return %c0_i32, %arg0 : i32, i32
  }
  func.func @transform_7(%arg0: i32, %arg1: i32) -> (i32, i32) {
    %c0_i32 = arith.constant 0 : i32
    %c0_i32_0 = arith.constant 0 : i32
    return %c0_i32, %arg0 : i32, i32
  }
}

</mosaic_0001>

<bundles_post_ra>
// kernel: tpu_custom_call.1
= control target key start
LH: loop header
LB: loop body
LE: loop exit
PB: predicated region body
PF: predicated region fallthrough
CT: control target
= control target key end

     0   :  { %12 = vsyncpa [#allocation4], 0  ;;  %s861_s0 = inlined_call_operand.hbm [shape: f32[8,384], index: 0, kind: input, shape index: {}]   ;;  %s862_s1 = inlined_call_operand.hbm [shape: f32[256,384], index: 1, kind: input, shape index: {}]   ;;  %s863_s2 = inlined_call_operand.hbm [shape: f32[256,384], index: 2, kind: input, shape index: {}]   ;;  %s864_s3 = inlined_call_operand.hbm [shape: f32[1,384], index: 3, kind: input, shape index: {}]   ;;  %s865_s4 = inlined_call_operand.vmem [shape: f32[1,256], index: 4, kind: input, shape index: {}]   ;;  %s866_s5 = inlined_call_operand.vmem [shape: f32[1,256], index: 5, kind: input, shape index: {}]   ;;  %s867_s6 = inlined_call_operand.hbm [shape: f32[1,256], index: 6, kind: input, shape index: {}]   ;;  %s868_s7 = inlined_call_operand.hbm [shape: f32[8,256], index: 7, kind: output, shape index: {}]  }
   0x1   :  { %13 = vsyncpa [#allocation7], 0 }
   0x2   :  { %14 = vsyncpa [#allocation10], 0  ;;  %s31_s26 = sshll.u32 %s862_s1, 4  ;;  %s32_s26 = int_to_ptr.hbm [resolvable:$true] %s31_s26 }
   0x3   :  { %15 = vsyncpa [#allocation5], 0  ;;  %s763_s27 = smov [#allocation6]   ;;  %s58_s8 = sshll.u32 %s864_s3, 4  ;;  %s59_s8 = int_to_ptr.hbm [resolvable:$true] %s58_s8 }
   0x4   :  { %s33_s28 = sshll.u32 %s763_s27, 4  ;;  %s764_s9 = smov 384   ;;  %s34_s28 = int_to_ptr.vmem [resolvable:$true] %s33_s28 }
   0x5   :  { %s765_s10 = smov 24   ;;  %s766_s11 = smov [#allocation9]  }
   0x6   :  { %39 = dma.hbm_to_vmem [thread:$0]  %s32_s26, 12288, %s34_s28, [#allocation7], %s764_s9, %s764_s9, %s765_s10  }
   0x7   :  { %s60_s12 = sshll.u32 %s766_s11, 4  ;;  %s21_s15 = sshll.u32 %s861_s0, 4  ;;  %s61_s12 = int_to_ptr.vmem [resolvable:$true] %s60_s12  ;;  %s22_s15 = int_to_ptr.hbm [resolvable:$true] %s21_s15 }
   0x8   :  { %63 = dma.hbm_to_vmem [thread:$0]  %s59_s8, 48, %s61_s12, [#allocation10]  }
   0x9   :  { %s44_s17 = sshll.u32 %s863_s2, 4  ;;  %s767_s18 = smov [#allocation3]   ;;  %s45_s17 = int_to_ptr.hbm [resolvable:$true] %s44_s17 }
   0xa   :  { %s23_s19 = sshll.u32 %s767_s18, 4  ;;  %s768_s3 = smov [#allocation8]   ;;  %s24_s19 = int_to_ptr.vmem [resolvable:$true] %s23_s19 }
   0xb   :  { %26 = dma.hbm_to_vmem [thread:$0]  %s22_s15, 384, %s24_s19, [#allocation4]  }
   0xc   :  { %s46_s20 = sshll.u32 %s768_s3, 4  ;;  %s73_s23 = sshll.u32 %s867_s6, 4  ;;  %s47_s20 = int_to_ptr.vmem [resolvable:$true] %s46_s20  ;;  %s74_s23 = int_to_ptr.hbm [resolvable:$true] %s73_s23 }
   0xd   :  { %52 = dma.hbm_to_vmem [thread:$0]  %s45_s17, 12288, %s47_s20, [#allocation7], %s764_s9, %s764_s9, %s765_s10  }
   0xe   :  { %s769_s0 = smov [#allocation11]  }
   0xf   :  { %s75_s24 = sshll.u32 %s769_s0, 4  ;;  %s76_s24 = int_to_ptr.vmem [resolvable:$true] %s75_s24 }
  0x10   :  { %78 = dma.hbm_to_vmem [thread:$0]  %s74_s23, 32, %s76_s24, [#allocation10]  }
  0x11   :  { %755 = dma.done.wait [#allocation4], 384  }
  0x12   :  { %756 = vsyncadd [#allocation4], 4294966912 }
  0x13   :  { %757 = dma.done.wait [#allocation7], 24576  }
  0x14   :  { %758 = vsyncadd [#allocation7], 4294942720 }
  0x15   :  { %759 = dma.done.wait [#allocation10], 80  }
  0x16   :  { %760 = vsyncadd [#allocation10], 4294967216  ;;  %v260_v0 = vld [vmem:[#allocation8 + $0x168] sm:$0xff]  ;;  %v261_v1 = vld [vmem:[#allocation8 + $0x170] sm:$0xff]  ;;  %s591_s8 = sshll.u32 %s868_s7, 4  ;;  %s592_s8 = int_to_ptr.hbm [resolvable:$true] %s591_s8 }
  0x17   :  { %v262_v2 = vld [vmem:[#allocation8 + $0x178] sm:$0xff]  ;;  %311 = vmatpush.xpose.msra.mxu0 %v260_v0  ;;  %331 = vmatpush.xpose.msra.mxu1 %v261_v1  ;;  %v308_v3 = vld [vmem:[#allocation8 + $0x2e8] sm:$0xff]  ;;  %v257_v4 = vld [vmem:[#allocation8 + $0x150] sm:$0xff] }
  0x18   :  { %351 = vmatpush.xpose.msra.mxu2 %v262_v2  ;;  %371 = vmatpush.xpose.msra.mxu3 %v308_v3  ;;  %v258_v5 = vld [vmem:[#allocation8 + $0x158] sm:$0xff]  ;;  %v259_v6 = vld [vmem:[#allocation8 + $0x160] sm:$0xff]  ;;  %v305_v7 = vld [vmem:[#allocation8 + $0x2d0] sm:$0xff] }
  0x19   :  { %v254_v8 = vld [vmem:[#allocation8 + $0x138] sm:$0xff]  ;;  %v255_v9 = vld [vmem:[#allocation8 + $0x140] sm:$0xff]  ;;  %v256_v10 = vld [vmem:[#allocation8 + $0x148] sm:$0xff] }
  0x1a   :  { %v302_v11 = vld [vmem:[#allocation8 + $0x2b8] sm:$0xff]  ;;  %v251_v12 = vld [vmem:[#allocation8 + $0x120] sm:$0xff]  ;;  %v252_v13 = vld [vmem:[#allocation8 + $0x128] sm:$0xff] }
  0x1b   :  { %312 = vmatpush.xpose.msra.mxu0 %v257_v4  ;;  %332 = vmatpush.xpose.msra.mxu1 %v258_v5  ;;  %v253_v14 = vld [vmem:[#allocation8 + $0x130] sm:$0xff]  ;;  %v299_v15 = vld [vmem:[#allocation8 + $0x2a0] sm:$0xff]  ;;  %v248_v16 = vld [vmem:[#allocation8 + $0x108] sm:$0xff] }
  0x1c   :  { %352 = vmatpush.xpose.msra.mxu2 %v259_v6  ;;  %372 = vmatpush.xpose.msra.mxu3 %v305_v7  ;;  %v249_v17 = vld [vmem:[#allocation8 + $0x110] sm:$0xff]  ;;  %v250_v18 = vld [vmem:[#allocation8 + $0x118] sm:$0xff]  ;;  %v296_v19 = vld [vmem:[#allocation8 + $0x288] sm:$0xff] }
  0x1d   :  { %v245_v20 = vld [vmem:[#allocation8 + $0xf0] sm:$0xff]  ;;  %v246_v21 = vld [vmem:[#allocation8 + $0xf8] sm:$0xff]  ;;  %v247_v22 = vld [vmem:[#allocation8 + $0x100] sm:$0xff] }
  0x1e   :  { %v293_v23 = vld [vmem:[#allocation8 + $0x270] sm:$0xff]  ;;  %v242_v24 = vld [vmem:[#allocation8 + $0xd8] sm:$0xff]  ;;  %v243_v25 = vld [vmem:[#allocation8 + $0xe0] sm:$0xff] }
  0x1f   :  { %313 = vmatpush.xpose.msra.mxu0 %v254_v8  ;;  %333 = vmatpush.xpose.msra.mxu1 %v255_v9  ;;  %v244_v26 = vld [vmem:[#allocation8 + $0xe8] sm:$0xff]  ;;  %v290_v27 = vld [vmem:[#allocation8 + $0x258] sm:$0xff]  ;;  %v239_v28 = vld [vmem:[#allocation8 + $0xc0] sm:$0xff] }
  0x20   :  { %353 = vmatpush.xpose.msra.mxu2 %v256_v10  ;;  %373 = vmatpush.xpose.msra.mxu3 %v302_v11  ;;  %v240_v29 = vld [vmem:[#allocation8 + $0xc8] sm:$0xff]  ;;  %v241_v30 = vld [vmem:[#allocation8 + $0xd0] sm:$0xff]  ;;  %v287_v31 = vld [vmem:[#allocation8 + $0x240] sm:$0xff] }
  0x21   :  { %v236_v32 = vld [vmem:[#allocation8 + $0xa8] sm:$0xff]  ;;  %v237_v33 = vld [vmem:[#allocation8 + $0xb0] sm:$0xff]  ;;  %v238_v34 = vld [vmem:[#allocation8 + $0xb8] sm:$0xff] }
  0x22   :  { %v284_v35 = vld [vmem:[#allocation8 + $0x228] sm:$0xff]  ;;  %v233_v36 = vld [vmem:[#allocation8 + $0x90] sm:$0xff]  ;;  %v234_v37 = vld [vmem:[#allocation8 + $0x98] sm:$0xff] }
  0x23   :  { %314 = vmatpush.xpose.msra.mxu0 %v251_v12  ;;  %334 = vmatpush.xpose.msra.mxu1 %v252_v13  ;;  %v235_v38 = vld [vmem:[#allocation8 + $0xa0] sm:$0xff]  ;;  %v281_v39 = vld [vmem:[#allocation8 + $0x210] sm:$0xff]  ;;  %v230_v40 = vld [vmem:[#allocation8 + $0x78] sm:$0xff] }
  0x24   :  { %354 = vmatpush.xpose.msra.mxu2 %v253_v14  ;;  %374 = vmatpush.xpose.msra.mxu3 %v299_v15  ;;  %v231_v41 = vld [vmem:[#allocation8 + $0x80] sm:$0xff]  ;;  %v232_v42 = vld [vmem:[#allocation8 + $0x88] sm:$0xff]  ;;  %v278_v43 = vld [vmem:[#allocation8 + $0x1f8] sm:$0xff] }
  0x25   :  { %v227_v44 = vld [vmem:[#allocation8 + $0x60] sm:$0xff]  ;;  %v228_v45 = vld [vmem:[#allocation8 + $0x68] sm:$0xff]  ;;  %v229_v46 = vld [vmem:[#allocation8 + $0x70] sm:$0xff] }
  0x26   :  { %v275_v47 = vld [vmem:[#allocation8 + $0x1e0] sm:$0xff]  ;;  %v224_v48 = vld [vmem:[#allocation8 + $0x48] sm:$0xff]  ;;  %v225_v49 = vld [vmem:[#allocation8 + $0x50] sm:$0xff] }
  0x27   :  { %315 = vmatpush.xpose.msra.mxu0 %v248_v16  ;;  %335 = vmatpush.xpose.msra.mxu1 %v249_v17  ;;  %v226_v50 = vld [vmem:[#allocation8 + $0x58] sm:$0xff]  ;;  %v272_v51 = vld [vmem:[#allocation8 + $0x1c8] sm:$0xff]  ;;  %v221_v52 = vld [vmem:[#allocation8 + $0x30] sm:$0xff] }
  0x28   :  { %355 = vmatpush.xpose.msra.mxu2 %v250_v18  ;;  %375 = vmatpush.xpose.msra.mxu3 %v296_v19  ;;  %v222_v53 = vld [vmem:[#allocation8 + $0x38] sm:$0xff]  ;;  %v223_v54 = vld [vmem:[#allocation8 + $0x40] sm:$0xff]  ;;  %v269_v55 = vld [vmem:[#allocation8 + $0x1b0] sm:$0xff] }
  0x29   :  { %v218_v56 = vld [vmem:[#allocation8 + $0x18] sm:$0xff]  ;;  %v219_v57 = vld [vmem:[#allocation8 + $0x20] sm:$0xff]  ;;  %v220_v58 = vld [vmem:[#allocation8 + $0x28] sm:$0xff] }
  0x2a   :  { %v266_v59 = vld [vmem:[#allocation8 + $0x198] sm:$0xff]  ;;  %v215_v60 = vld [vmem:[#allocation8] sm:$0xff]  ;;  %v216_v61 = vld [vmem:[#allocation8 + $0x8] sm:$0xff] }
  0x2b   :  { %316 = vmatpush.xpose.msra.mxu0 %v245_v20  ;;  %336 = vmatpush.xpose.msra.mxu1 %v246_v21  ;;  %v217_v62 = vld [vmem:[#allocation8 + $0x10] sm:$0xff]  ;;  %v310_v0 = vld [vmem:[#allocation8 + $0x2f8] sm:$0xff]  ;;  %v164_v1 = vld [vmem:[#allocation6 + $0x168] sm:$0xff] }
  0x2c   :  { %356 = vmatpush.xpose.msra.mxu2 %v247_v22  ;;  %376 = vmatpush.xpose.msra.mxu3 %v293_v23  ;;  %v309_v63 = vld [vmem:[#allocation8 + $0x2f0] sm:$0xff]  ;;  %v263_v2 = vld [vmem:[#allocation8 + $0x180] sm:$0xff]  ;;  %v306_v4 = vld [vmem:[#allocation8 + $0x2d8] sm:$0xff] }
  0x2d   :  { %v165_v3 = vld [vmem:[#allocation6 + $0x170] sm:$0xff]  ;;  %v307_v5 = vld [vmem:[#allocation8 + $0x2e0] sm:$0xff]  ;;  %v162_v7 = vld [vmem:[#allocation6 + $0x158] sm:$0xff] }
  0x2e   :  { %v161_v6 = vld [vmem:[#allocation6 + $0x150] sm:$0xff]  ;;  %v303_v8 = vld [vmem:[#allocation8 + $0x2c0] sm:$0xff]  ;;  %v304_v9 = vld [vmem:[#allocation8 + $0x2c8] sm:$0xff] }
  0x2f   :  { %317 = vmatpush.xpose.msra.mxu0 %v242_v24  ;;  %337 = vmatpush.xpose.msra.mxu1 %v243_v25  ;;  %v158_v10 = vld [vmem:[#allocation6 + $0x138] sm:$0xff]  ;;  %v159_v11 = vld [vmem:[#allocation6 + $0x140] sm:$0xff]  ;;  %v300_v12 = vld [vmem:[#allocation8 + $0x2a8] sm:$0xff] }
  0x30   :  { %357 = vmatpush.xpose.msra.mxu2 %v244_v26  ;;  %377 = vmatpush.xpose.msra.mxu3 %v290_v27  ;;  %v301_v13 = vld [vmem:[#allocation8 + $0x2b0] sm:$0xff]  ;;  %v155_v14 = vld [vmem:[#allocation6 + $0x120] sm:$0xff]  ;;  %v156_v15 = vld [vmem:[#allocation6 + $0x128] sm:$0xff] }
  0x31   :  { %v297_v16 = vld [vmem:[#allocation8 + $0x290] sm:$0xff]  ;;  %v298_v17 = vld [vmem:[#allocation8 + $0x298] sm:$0xff]  ;;  %v152_v18 = vld [vmem:[#allocation6 + $0x108] sm:$0xff] }
  0x32   :  { %v153_v19 = vld [vmem:[#allocation6 + $0x110] sm:$0xff]  ;;  %v294_v20 = vld [vmem:[#allocation8 + $0x278] sm:$0xff]  ;;  %v295_v21 = vld [vmem:[#allocation8 + $0x280] sm:$0xff] }
  0x33   :  { %318 = vmatpush.xpose.msra.mxu0 %v239_v28  ;;  %338 = vmatpush.xpose.msra.mxu1 %v240_v29  ;;  %v149_v22 = vld [vmem:[#allocation6 + $0xf0] sm:$0xff]  ;;  %v150_v23 = vld [vmem:[#allocation6 + $0xf8] sm:$0xff]  ;;  %v291_v24 = vld [vmem:[#allocation8 + $0x260] sm:$0xff] }
  0x34   :  { %358 = vmatpush.xpose.msra.mxu2 %v241_v30  ;;  %378 = vmatpush.xpose.msra.mxu3 %v287_v31  ;;  %v108_v25 = vld [vmem:[#allocation9] sm:$0x7]  ;;  %v292_v26 = vld [vmem:[#allocation8 + $0x268] sm:$0xff]  ;;  %v146_v27 = vld [vmem:[#allocation6 + $0xd8] sm:$0xff] }
  0x35   :  { %v112_v28 = vperm.slane %v108_v25, 2  ;;  %v826_v29 = vld [vmem:[#allocation3 + $0x10] sm:$0xff]  ;;  %v147_v30 = vld [vmem:[#allocation6 + $0xe0] sm:$0xff] }
  0x37   :  { %319 = vmatpush.xpose.msra.mxu0 %v236_v32  ;;  %339 = vmatpush.xpose.msra.mxu1 %v237_v33  ;;  %v829_v31 = vmul.f32 %v112_v28, %v826_v29  ;;  %v110_v32 = vperm.slane %v108_v25, 0  ;;  %v288_v33 = vld [vmem:[#allocation8 + $0x248] sm:$0xff]  ;;  %v201_v28 = vld [vmem:[#allocation6 + $0x290] sm:$0xff] }
  0x38   :  { %359 = vmatpush.xpose.msra.mxu2 %v238_v34  ;;  %379 = vmatpush.xpose.msra.mxu3 %v284_v35  ;;  %v831_v34 = vld [vmem:[#allocation3] sm:$0xff]  ;;  %v289_v35 = vld [vmem:[#allocation8 + $0x250] sm:$0xff] }
  0x3b   :  { %320 = vmatpush.xpose.msra.mxu0 %v233_v36  ;;  %340 = vmatpush.xpose.msra.mxu1 %v234_v37  ;;  %v143_v36 = vld [vmem:[#allocation6 + $0xc0] sm:$0xff]  ;;  %v116_v37 = vmul.f32 %v110_v32, %v831_v34  ;;  %v197_v32 = vld [vmem:[#allocation6 + $0x270] sm:$0xff] }
  0x3c   :  { %360 = vmatpush.xpose.msra.mxu2 %v235_v38  ;;  %380 = vmatpush.xpose.msra.mxu3 %v281_v39  ;;  %v111_v38 = vperm.slane %v108_v25, 1  ;;  %v835_v39 = vld [vmem:[#allocation3 + $0x8] sm:$0xff] }
  0x3d   :  { %v205_v25 = vld [vmem:[#allocation6 + $0x2b0] sm:$0xff] }
  0x3f   :  { %321 = vmatpush.xpose.msra.mxu0 %v230_v40  ;;  %341 = vmatpush.xpose.msra.mxu1 %v231_v41  ;;  %v144_v40 = vld [vmem:[#allocation6 + $0xc8] sm:$0xff]  ;;  %v838_v41 = vmul.f32 %v111_v38, %v835_v39  ;;  %v195_v38 = vld [vmem:[#allocation6 + $0x260] sm:$0xff] }
  0x40   :  { %361 = vmatpush.xpose.msra.mxu2 %v232_v42  ;;  %381 = vmatpush.xpose.msra.mxu3 %v278_v43  ;;  %v285_v42 = vld [vmem:[#allocation8 + $0x230] sm:$0xff]  ;;  %v286_v43 = vld [vmem:[#allocation8 + $0x238] sm:$0xff] }
  0x43   :  { %322 = vmatpush.xpose.msra.mxu0 %v227_v44  ;;  %342 = vmatpush.xpose.msra.mxu1 %v228_v45  ;;  %v140_v44 = vld [vmem:[#allocation6 + $0xa8] sm:$0xff]  ;;  %v141_v45 = vld [vmem:[#allocation6 + $0xb0] sm:$0xff] }
  0x44   :  { %362 = vmatpush.xpose.msra.mxu2 %v229_v46  ;;  %382 = vmatpush.xpose.msra.mxu3 %v275_v47  ;;  %v282_v46 = vld [vmem:[#allocation8 + $0x218] sm:$0xff]  ;;  %v283_v47 = vld [vmem:[#allocation8 + $0x220] sm:$0xff] }
  0x47   :  { %323 = vmatpush.xpose.msra.mxu0 %v224_v48  ;;  %343 = vmatpush.xpose.msra.mxu1 %v225_v49  ;;  %v137_v48 = vld [vmem:[#allocation6 + $0x90] sm:$0xff]  ;;  %v138_v49 = vld [vmem:[#allocation6 + $0x98] sm:$0xff] }
  0x48   :  { %363 = vmatpush.xpose.msra.mxu2 %v226_v50  ;;  %383 = vmatpush.xpose.msra.mxu3 %v272_v51  ;;  %v279_v50 = vld [vmem:[#allocation8 + $0x200] sm:$0xff]  ;;  %v280_v51 = vld [vmem:[#allocation8 + $0x208] sm:$0xff] }
  0x4b   :  { %324 = vmatpush.xpose.msra.mxu0 %v221_v52  ;;  %344 = vmatpush.xpose.msra.mxu1 %v222_v53  ;;  %v134_v52 = vld [vmem:[#allocation6 + $0x78] sm:$0xff]  ;;  %v135_v53 = vld [vmem:[#allocation6 + $0x80] sm:$0xff] }
  0x4c   :  { %364 = vmatpush.xpose.msra.mxu2 %v223_v54  ;;  %384 = vmatpush.xpose.msra.mxu3 %v269_v55  ;;  %v276_v54 = vld [vmem:[#allocation8 + $0x1e8] sm:$0xff]  ;;  %v277_v55 = vld [vmem:[#allocation8 + $0x1f0] sm:$0xff] }
  0x4f   :  { %325 = vmatpush.xpose.msra.mxu0 %v218_v56  ;;  %345 = vmatpush.xpose.msra.mxu1 %v219_v57  ;;  %v131_v56 = vld [vmem:[#allocation6 + $0x60] sm:$0xff]  ;;  %v132_v57 = vld [vmem:[#allocation6 + $0x68] sm:$0xff] }
  0x50   :  { %365 = vmatpush.xpose.msra.mxu2 %v220_v58  ;;  %385 = vmatpush.xpose.msra.mxu3 %v266_v59  ;;  %v273_v58 = vld [vmem:[#allocation8 + $0x1d0] sm:$0xff]  ;;  %v274_v59 = vld [vmem:[#allocation8 + $0x1d8] sm:$0xff] }
  0x53   :  { %326 = vmatpush.xpose.msra.mxu0 %v215_v60  ;;  %346 = vmatpush.xpose.msra.mxu1 %v216_v61  ;;  %v128_v60 = vld [vmem:[#allocation6 + $0x48] sm:$0xff]  ;;  %v129_v61 = vld [vmem:[#allocation6 + $0x50] sm:$0xff] }
  0x54   :  { %366 = vmatpush.xpose.msra.mxu2 %v217_v62  ;;  %386 = vmatpush.xpose.msra.mxu3 %v263_v2  ;;  %v270_v62 = vld [vmem:[#allocation8 + $0x1b8] sm:$0xff]  ;;  %v267_v2 = vld [vmem:[#allocation8 + $0x1a0] sm:$0xff] }
  0x56   :  { %327 = vmatmul.f32.vlgmr.msra.gmra.mxu0 %v116_v37  ;;  %347 = vmatmul.f32.vlgmr.msra.gmra.mxu1 %v838_v41 }
  0x57   :  { %391 = vmatpush.xpose.msrb.mxu0 %v309_v63  ;;  %411 = vmatpush.xpose.msrb.mxu1 %v310_v0  ;;  %v271_v63 = vld [vmem:[#allocation8 + $0x1c0] sm:$0xff]  ;;  %v125_v0 = vld [vmem:[#allocation6 + $0x30] sm:$0xff] }
  0x58   :  { %441 = vmatpush.xpose.msrb.mxu2 %v164_v1  ;;  %461 = vmatpush.xpose.msrb.mxu3 %v165_v3  ;;  %v126_v1 = vld [vmem:[#allocation6 + $0x38] sm:$0xff]  ;;  %v268_v3 = vld [vmem:[#allocation8 + $0x1a8] sm:$0xff] }
  0x59   :  { %367 = vmatmul.f32.vlgmr.msra.gmra.mxu2 %v829_v31  ;;  %387 = vmatmul.f32.vlgmr.msra.gmra.mxu3 %v116_v37  ;;  %v194_v37 = vld [vmem:[#allocation6 + $0x258] sm:$0xff] }
  0x5b   :  { %392 = vmatpush.xpose.msrb.mxu0 %v306_v4  ;;  %412 = vmatpush.xpose.msrb.mxu1 %v307_v5  ;;  %v122_v4 = vld [vmem:[#allocation6 + $0x18] sm:$0xff]  ;;  %v123_v5 = vld [vmem:[#allocation6 + $0x20] sm:$0xff] }
  0x5c   :  { %442 = vmatpush.xpose.msrb.mxu2 %v161_v6  ;;  %462 = vmatpush.xpose.msrb.mxu3 %v162_v7  ;;  %v264_v6 = vld [vmem:[#allocation8 + $0x188] sm:$0xff]  ;;  %v265_v7 = vld [vmem:[#allocation8 + $0x190] sm:$0xff] }
  0x5f   :  { %393 = vmatpush.xpose.msrb.mxu0 %v303_v8  ;;  %413 = vmatpush.xpose.msrb.mxu1 %v304_v9  ;;  %v119_v8 = vld [vmem:[#allocation6] sm:$0xff]  ;;  %v166_v9 = vld [vmem:[#allocation6 + $0x178] sm:$0xff] }
  0x60   :  { %443 = vmatpush.xpose.msrb.mxu2 %v158_v10  ;;  %463 = vmatpush.xpose.msrb.mxu3 %v159_v11  ;;  %v212_v10 = vld [vmem:[#allocation6 + $0x2e8] sm:$0xff]  ;;  %v213_v11 = vld [vmem:[#allocation6 + $0x2f0] sm:$0xff] }
  0x63   :  { %394 = vmatpush.xpose.msrb.mxu0 %v300_v12  ;;  %414 = vmatpush.xpose.msrb.mxu1 %v301_v13  ;;  %v120_v12 = vld [vmem:[#allocation6 + $0x8] sm:$0xff]  ;;  %v214_v13 = vld [vmem:[#allocation6 + $0x2f8] sm:$0xff] }
  0x64   :  { %444 = vmatpush.xpose.msrb.mxu2 %v155_v14  ;;  %464 = vmatpush.xpose.msrb.mxu3 %v156_v15  ;;  %v163_v14 = vld [vmem:[#allocation6 + $0x160] sm:$0xff]  ;;  %v209_v15 = vld [vmem:[#allocation6 + $0x2d0] sm:$0xff] }
  0x67   :  { %395 = vmatpush.xpose.msrb.mxu0 %v297_v16  ;;  %415 = vmatpush.xpose.msrb.mxu1 %v298_v17  ;;  %v210_v16 = vld [vmem:[#allocation6 + $0x2d8] sm:$0xff]  ;;  %v211_v17 = vld [vmem:[#allocation6 + $0x2e0] sm:$0xff] }
  0x68   :  { %445 = vmatpush.xpose.msrb.mxu2 %v152_v18  ;;  %465 = vmatpush.xpose.msrb.mxu3 %v153_v19  ;;  %v160_v18 = vld [vmem:[#allocation6 + $0x148] sm:$0xff]  ;;  %v206_v19 = vld [vmem:[#allocation6 + $0x2b8] sm:$0xff] }
  0x6b   :  { %396 = vmatpush.xpose.msrb.mxu0 %v294_v20  ;;  %416 = vmatpush.xpose.msrb.mxu1 %v295_v21  ;;  %v207_v20 = vld [vmem:[#allocation6 + $0x2c0] sm:$0xff]  ;;  %v208_v21 = vld [vmem:[#allocation6 + $0x2c8] sm:$0xff] }
  0x6c   :  { %446 = vmatpush.xpose.msrb.mxu2 %v149_v22  ;;  %466 = vmatpush.xpose.msrb.mxu3 %v150_v23  ;;  %v157_v22 = vld [vmem:[#allocation6 + $0x130] sm:$0xff]  ;;  %v203_v23 = vld [vmem:[#allocation6 + $0x2a0] sm:$0xff] }
  0x6f   :  { %397 = vmatpush.xpose.msrb.mxu0 %v291_v24  ;;  %417 = vmatpush.xpose.msrb.mxu1 %v292_v26  ;;  %v204_v24 = vld [vmem:[#allocation6 + $0x2a8] sm:$0xff]  ;;  %v154_v26 = vld [vmem:[#allocation6 + $0x118] sm:$0xff] }
  0x70   :  { %447 = vmatpush.xpose.msrb.mxu2 %v146_v27  ;;  %467 = vmatpush.xpose.msrb.mxu3 %v147_v30  ;;  %v200_v27 = vld [vmem:[#allocation6 + $0x288] sm:$0xff]  ;;  %v202_v30 = vld [vmem:[#allocation6 + $0x298] sm:$0xff] }
  0x73   :  { %398 = vmatpush.xpose.msrb.mxu0 %v288_v33  ;;  %418 = vmatpush.xpose.msrb.mxu1 %v289_v35  ;;  %v198_v33 = vld [vmem:[#allocation6 + $0x278] sm:$0xff]  ;;  %v199_v35 = vld [vmem:[#allocation6 + $0x280] sm:$0xff] }
  0x74   :  { %448 = vmatpush.xpose.msrb.mxu2 %v143_v36  ;;  %468 = vmatpush.xpose.msrb.mxu3 %v144_v40  ;;  %v148_v36 = vld [vmem:[#allocation6 + $0xe8] sm:$0xff] }
  0x75   :  { %v196_v40 = vld [vmem:[#allocation6 + $0x268] sm:$0xff] }
  0x77   :  { %399 = vmatpush.xpose.msrb.mxu0 %v285_v42  ;;  %419 = vmatpush.xpose.msrb.mxu1 %v286_v43  ;;  %v191_v42 = vld [vmem:[#allocation6 + $0x240] sm:$0xff]  ;;  %v192_v43 = vld [vmem:[#allocation6 + $0x248] sm:$0xff] }
  0x78   :  { %449 = vmatpush.xpose.msrb.mxu2 %v140_v44  ;;  %469 = vmatpush.xpose.msrb.mxu3 %v141_v45  ;;  %v193_v44 = vld [vmem:[#allocation6 + $0x250] sm:$0xff]  ;;  %v142_v45 = vld [vmem:[#allocation6 + $0xb8] sm:$0xff] }
  0x7b   :  { %400 = vmatpush.xpose.msrb.mxu0 %v282_v46  ;;  %420 = vmatpush.xpose.msrb.mxu1 %v283_v47  ;;  %v188_v46 = vld [vmem:[#allocation6 + $0x228] sm:$0xff]  ;;  %v189_v47 = vld [vmem:[#allocation6 + $0x230] sm:$0xff] }
  0x7c   :  { %450 = vmatpush.xpose.msrb.mxu2 %v137_v48  ;;  %470 = vmatpush.xpose.msrb.mxu3 %v138_v49  ;;  %v190_v48 = vld [vmem:[#allocation6 + $0x238] sm:$0xff]  ;;  %v139_v49 = vld [vmem:[#allocation6 + $0xa0] sm:$0xff] }
  0x7f   :  { %401 = vmatpush.xpose.msrb.mxu0 %v279_v50  ;;  %421 = vmatpush.xpose.msrb.mxu1 %v280_v51  ;;  %v185_v50 = vld [vmem:[#allocation6 + $0x210] sm:$0xff]  ;;  %v186_v51 = vld [vmem:[#allocation6 + $0x218] sm:$0xff] }
  0x80   :  { %451 = vmatpush.xpose.msrb.mxu2 %v134_v52  ;;  %471 = vmatpush.xpose.msrb.mxu3 %v135_v53  ;;  %v187_v52 = vld [vmem:[#allocation6 + $0x220] sm:$0xff]  ;;  %v136_v53 = vld [vmem:[#allocation6 + $0x88] sm:$0xff] }
  0x83   :  { %402 = vmatpush.xpose.msrb.mxu0 %v276_v54  ;;  %422 = vmatpush.xpose.msrb.mxu1 %v277_v55  ;;  %v182_v54 = vld [vmem:[#allocation6 + $0x1f8] sm:$0xff]  ;;  %v183_v55 = vld [vmem:[#allocation6 + $0x200] sm:$0xff] }
  0x84   :  { %452 = vmatpush.xpose.msrb.mxu2 %v131_v56  ;;  %472 = vmatpush.xpose.msrb.mxu3 %v132_v57  ;;  %v184_v56 = vld [vmem:[#allocation6 + $0x208] sm:$0xff]  ;;  %v133_v57 = vld [vmem:[#allocation6 + $0x70] sm:$0xff] }
  0x87   :  { %403 = vmatpush.xpose.msrb.mxu0 %v273_v58  ;;  %423 = vmatpush.xpose.msrb.mxu1 %v274_v59  ;;  %v179_v58 = vld [vmem:[#allocation6 + $0x1e0] sm:$0xff]  ;;  %v180_v59 = vld [vmem:[#allocation6 + $0x1e8] sm:$0xff] }
  0x88   :  { %453 = vmatpush.xpose.msrb.mxu2 %v128_v60  ;;  %473 = vmatpush.xpose.msrb.mxu3 %v129_v61  ;;  %v181_v60 = vld [vmem:[#allocation6 + $0x1f0] sm:$0xff]  ;;  %v130_v61 = vld [vmem:[#allocation6 + $0x58] sm:$0xff] }
  0x8b   :  { %404 = vmatpush.xpose.msrb.mxu0 %v270_v62  ;;  %424 = vmatpush.xpose.msrb.mxu1 %v271_v63  ;;  %v176_v62 = vld [vmem:[#allocation6 + $0x1c8] sm:$0xff]  ;;  %v177_v63 = vld [vmem:[#allocation6 + $0x1d0] sm:$0xff] }
  0x8c   :  { %454 = vmatpush.xpose.msrb.mxu2 %v125_v0  ;;  %474 = vmatpush.xpose.msrb.mxu3 %v126_v1  ;;  %v178_v0 = vld [vmem:[#allocation6 + $0x1d8] sm:$0xff]  ;;  %v127_v1 = vld [vmem:[#allocation6 + $0x40] sm:$0xff] }
  0x8f   :  { %405 = vmatpush.xpose.msrb.mxu0 %v267_v2  ;;  %425 = vmatpush.xpose.msrb.mxu1 %v268_v3  ;;  %v173_v2 = vld [vmem:[#allocation6 + $0x1b0] sm:$0xff]  ;;  %v174_v3 = vld [vmem:[#allocation6 + $0x1b8] sm:$0xff] }
  0x90   :  { %455 = vmatpush.xpose.msrb.mxu2 %v122_v4  ;;  %475 = vmatpush.xpose.msrb.mxu3 %v123_v5  ;;  %v175_v4 = vld [vmem:[#allocation6 + $0x1c0] sm:$0xff]  ;;  %v124_v5 = vld [vmem:[#allocation6 + $0x28] sm:$0xff] }
  0x93   :  { %406 = vmatpush.xpose.msrb.mxu0 %v264_v6  ;;  %426 = vmatpush.xpose.msrb.mxu1 %v265_v7  ;;  %v170_v6 = vld [vmem:[#allocation6 + $0x198] sm:$0xff]  ;;  %v171_v7 = vld [vmem:[#allocation6 + $0x1a0] sm:$0xff] }
  0x94   :  { %456 = vmatpush.xpose.msrb.mxu2 %v119_v8  ;;  %476 = vmatpush.xpose.msrb.mxu3 %v120_v12  ;;  %v172_v8 = vld [vmem:[#allocation6 + $0x1a8] sm:$0xff]  ;;  %v169_v12 = vld [vmem:[#allocation6 + $0x190] sm:$0xff] }
  0x96   :  { %407 = vmatmul.f32.vlgmr.msrb.gmra.mxu0 %v838_v41  ;;  %427 = vmatmul.f32.vlgmr.msrb.gmra.mxu1 %v829_v31  ;;  %v151_v31 = vld [vmem:[#allocation6 + $0x100] sm:$0xff]  ;;  %v145_v41 = vld [vmem:[#allocation6 + $0xd0] sm:$0xff] }
  0x97   :  { %481 = vmatpush.xpose.msra.mxu0 %v166_v9  ;;  %501 = vmatpush.xpose.msra.mxu1 %v212_v10  ;;  %v121_v9 = vld [vmem:[#allocation6 + $0x10] sm:$0xff]  ;;  %v167_v10 = vld [vmem:[#allocation6 + $0x180] sm:$0xff] }
  0x98   :  { %521 = vmatpush.xpose.msra.mxu2 %v213_v11  ;;  %541 = vmatpush.xpose.msra.mxu3 %v214_v13  ;;  %v168_v11 = vld [vmem:[#allocation6 + $0x188] sm:$0xff] }
  0x99   :  { %457 = vmatmul.f32.vlgmr.msrb.gmra.mxu2 %v831_v34  ;;  %477 = vmatmul.f32.vlgmr.msrb.gmra.mxu3 %v835_v39 }
  0x9b   :  { %482 = vmatpush.xpose.msra.mxu0 %v163_v14  ;;  %502 = vmatpush.xpose.msra.mxu1 %v209_v15 }
  0x9c   :  { %522 = vmatpush.xpose.msra.mxu2 %v210_v16  ;;  %542 = vmatpush.xpose.msra.mxu3 %v211_v17  ;;  %v433_v17 = vld [vmem:[%s865_s4] sm:$0x3] }
  0x9f   :  { %483 = vmatpush.xpose.msra.mxu0 %v160_v18  ;;  %503 = vmatpush.xpose.msra.mxu1 %v206_v19 }
  0xa0   :  { %523 = vmatpush.xpose.msra.mxu2 %v207_v20  ;;  %543 = vmatpush.xpose.msra.mxu3 %v208_v21  ;;  %v435_v20 = vperm.slane %v433_v17, 0  ;;  %v569_v21 = vld [vmem:[#allocation11] sm:$0x3] }
  0xa3   :  { %484 = vmatpush.xpose.msra.mxu0 %v157_v22  ;;  %504 = vmatpush.xpose.msra.mxu1 %v203_v23 }
  0xa4   :  { %524 = vmatpush.xpose.msra.mxu2 %v204_v24  ;;  %544 = vmatpush.xpose.msra.mxu3 %v205_v25  ;;  %v568_v24 = vld [vmem:[%s866_s5] sm:$0x3] }
  0xa7   :  { %485 = vmatpush.xpose.msra.mxu0 %v154_v26  ;;  %505 = vmatpush.xpose.msra.mxu1 %v200_v27 }
  0xa8   :  { %525 = vmatpush.xpose.msra.mxu2 %v201_v28  ;;  %545 = vmatpush.xpose.msra.mxu3 %v202_v30 }
  0xab   :  { %486 = vmatpush.xpose.msra.mxu0 %v151_v31  ;;  %506 = vmatpush.xpose.msra.mxu1 %v197_v32 }
  0xac   :  { %526 = vmatpush.xpose.msra.mxu2 %v198_v33  ;;  %546 = vmatpush.xpose.msra.mxu3 %v199_v35 }
  0xaf   :  { %487 = vmatpush.xpose.msra.mxu0 %v148_v36  ;;  %507 = vmatpush.xpose.msra.mxu1 %v194_v37  ;;  %v436_v36 = vperm.slane %v433_v17, 1 }
  0xb0   :  { %527 = vmatpush.xpose.msra.mxu2 %v195_v38  ;;  %547 = vmatpush.xpose.msra.mxu3 %v196_v40 }
  0xb3   :  { %488 = vmatpush.xpose.msra.mxu0 %v145_v41  ;;  %508 = vmatpush.xpose.msra.mxu1 %v191_v42 }
  0xb4   :  { %528 = vmatpush.xpose.msra.mxu2 %v192_v43  ;;  %548 = vmatpush.xpose.msra.mxu3 %v193_v44 }
  0xb7   :  { %489 = vmatpush.xpose.msra.mxu0 %v142_v45  ;;  %509 = vmatpush.xpose.msra.mxu1 %v188_v46 }
  0xb8   :  { %529 = vmatpush.xpose.msra.mxu2 %v189_v47  ;;  %549 = vmatpush.xpose.msra.mxu3 %v190_v48 }
  0xbb   :  { %490 = vmatpush.xpose.msra.mxu0 %v139_v49  ;;  %510 = vmatpush.xpose.msra.mxu1 %v185_v50 }
  0xbc   :  { %530 = vmatpush.xpose.msra.mxu2 %v186_v51  ;;  %550 = vmatpush.xpose.msra.mxu3 %v187_v52 }
  0xbf   :  { %491 = vmatpush.xpose.msra.mxu0 %v136_v53  ;;  %511 = vmatpush.xpose.msra.mxu1 %v182_v54 }
  0xc0   :  { %531 = vmatpush.xpose.msra.mxu2 %v183_v55  ;;  %551 = vmatpush.xpose.msra.mxu3 %v184_v56 }
  0xc3   :  { %492 = vmatpush.xpose.msra.mxu0 %v133_v57  ;;  %512 = vmatpush.xpose.msra.mxu1 %v179_v58 }
  0xc4   :  { %532 = vmatpush.xpose.msra.mxu2 %v180_v59  ;;  %552 = vmatpush.xpose.msra.mxu3 %v181_v60 }
  0xc7   :  { %493 = vmatpush.xpose.msra.mxu0 %v130_v61  ;;  %513 = vmatpush.xpose.msra.mxu1 %v176_v62 }
  0xc8   :  { %533 = vmatpush.xpose.msra.mxu2 %v177_v63  ;;  %553 = vmatpush.xpose.msra.mxu3 %v178_v0 }
  0xcb   :  { %494 = vmatpush.xpose.msra.mxu0 %v127_v1  ;;  %514 = vmatpush.xpose.msra.mxu1 %v173_v2 }
  0xcc   :  { %534 = vmatpush.xpose.msra.mxu2 %v174_v3  ;;  %554 = vmatpush.xpose.msra.mxu3 %v175_v4 }
  0xcf   :  { %495 = vmatpush.xpose.msra.mxu0 %v124_v5  ;;  %515 = vmatpush.xpose.msra.mxu1 %v170_v6 }
  0xd0   :  { %535 = vmatpush.xpose.msra.mxu2 %v171_v7  ;;  %555 = vmatpush.xpose.msra.mxu3 %v172_v8 }
  0xd3   :  { %496 = vmatpush.xpose.msra.mxu0 %v121_v9  ;;  %516 = vmatpush.xpose.msra.mxu1 %v167_v10  ;;  %v328_v13 = vpop.f32.mrf.mxu0  ;;  %v348_v14 = vpop.f32.mrf.mxu1 }
  0xd4   :  { %536 = vmatpush.xpose.msra.mxu2 %v168_v11  ;;  %556 = vmatpush.xpose.msra.mxu3 %v169_v12  ;;  %v349_v16 = vadd.f32 %v348_v14, %v328_v13 }
  0xd6   :  { %497 = vmatmul.f32.vlgmr.msra.gmra.mxu0 %v826_v29  ;;  %517 = vmatmul.f32.vlgmr.msra.gmra.mxu1 %v831_v34  ;;  %v570_v34 = vld [vmem:[%s865_s4] sm:$0x3]  ;;  %s770_s4 = smov [#allocation12]  }
  0xd7   :  { %537 = vmatmul.f32.vlgmr.msra.gmra.mxu2 %v835_v39  ;;  %557 = vmatmul.f32.vlgmr.msra.gmra.mxu3 %v826_v29  ;;  %v571_v39 = vmul.f32 %v570_v34, %v569_v21  ;;  %s589_s5 = sshll.u32 %s770_s4, 4  ;;  %s590_s5 = int_to_ptr.vmem [resolvable:$true] %s589_s5 }
  0xd9   :  { %v572_v27 = vadd.f32 %v571_v39, %v568_v24 }
  0xdb   :  { %v576_v32 = vperm.slane %v572_v27, 0  ;;  %v577_v46 = vperm.slane %v572_v27, 1 }
  0xdc   :  { %v368_v15 = vpop.f32.mrf.mxu2  ;;  %v388_v18 = vpop.f32.mrf.mxu3 }
  0xdd   :  { %v369_v19 = vadd.f32 %v368_v15, %v349_v16 }
  0xdf   :  { %v439_v22 = vmul.f32 %v435_v20, %v369_v19 }
 0x113   :  { %v408_v23 = vpop.f32.mrf.mxu0  ;;  %v428_v25 = vpop.f32.mrf.mxu1 }
 0x114   :  { %v409_v28 = vadd.f32 %v408_v23, %v388_v18 }
 0x116   :  { %v429_v33 = vadd.f32 %v428_v25, %v409_v28 }
 0x118   :  { %v440_v41 = vmul.f32 %v436_v36, %v429_v33 }
 0x11c   :  { %v458_v29 = vpop.f32.mrf.mxu2  ;;  %v478_v30 = vpop.f32.mrf.mxu3 }
 0x11d   :  { %v459_v26 = vadd.f32 %v458_v29, %v439_v22 }
 0x11f   :  { %v479_v31 = vadd.f32 %v478_v30, %v459_v26 }
 0x153   :  { %v498_v35 = vpop.f32.mrf.mxu0  ;;  %v518_v40 = vpop.f32.mrf.mxu1 }
 0x154   :  { %v499_v37 = vadd.f32 %v498_v35, %v479_v31  ;;  %v519_v42 = vadd.f32 %v518_v40, %v440_v41 }
 0x156   :  { %v580_v38 = vadd.f32 %v576_v32, %v499_v37 }
 0x158   :  { %582 = vst [vmem:[#allocation12] sm:$0xff] %v580_v38 }
 0x15a   :  { %v538_v43 = vpop.f32.mrf.mxu2  ;;  %v558_v45 = vpop.f32.mrf.mxu3 }
 0x15b   :  { %v539_v44 = vadd.f32 %v538_v43, %v519_v42 }
 0x15d   :  { %v559_v47 = vadd.f32 %v558_v45, %v539_v44 }
 0x15f   :  { %v581_v48 = vadd.f32 %v577_v46, %v559_v47 }
 0x161   :  { %583 = vst [vmem:[#allocation12 + $0x8] sm:$0xff] %v581_v48 }
 0x162   :  { %594 = dma.vmem_to_hbm [thread:$0]  %s590_s5, 256, %s592_s8, [#allocation5]  }
 0x163   :  { %761 = dma.done.wait [#allocation5], 256  }
 0x164   :  { %762 = vsyncadd [#allocation5], 4294967040 }
 0x165   :  { %599 = vsyncpa [#allocation4], 1 }
 0x166   :  { %600 = vsyncpa [#allocation7], 1 }
 0x167   :  { %601 = vsyncpa [#allocation10], 1 }
 0x168   :  { %602 = vsyncpa [#allocation5], 1 }

</bundles_post_ra>
